<compile_context>
chip_gen: v7x
topology: tpu7x:2x2x1
jax: 0.10.0
libtpu: 0.0.40
codegen_flags: <defaults>
</compile_context>

<pallas_src>
import jax
import jax.numpy as jnp
from jax.experimental import pallas as pl
from jax.experimental.pallas import tpu as pltpu


# ----------------------------------------------------------------------------------
# Fused kernel: GAE + MSE + series_linear per node block, graph-max + softmax tail.
# ----------------------------------------------------------------------------------
def fd_kernel(x_ref,     # VMEM (TN, W, F) f32   feats for this node block
              w1_ref,    # VMEM (F, H)     bf16  GAE encoder
              w2_ref,    # VMEM (H, F)     bf16  GAE decoder
              ws_ref,    # VMEM (1, W)     f32   series_linear weight (per window pos)
              adj_ref,   # VMEM (N, N)     f32   self-loop-free adjacency (u -> v)
              wg_ref,    # SMEM (2,)       f32   graph_linear weight [w_pre, w_suc]
              out_ref,   # VMEM (1, N)     f32   softmax over nodes (lane-dense row)
              h_scr):    # VMEM (G, 1, TN) f32   per-block series scores (lane rows)
    i = pl.program_id(0)
    TN, W, F = x_ref.shape

    # ---- GAE reconstruction: relu(x @ W1) @ W2 (bf16 MXU inputs, f32 accumulate) ------
    x3 = x_ref[...]                                                    # f32 kept for MSE
    x2 = x3.reshape(TN * W, F)                                         # W = sublane-multiple
    xb = x2.astype(jnp.bfloat16)
    hid = jnp.maximum(
        jnp.dot(xb, w1_ref[...], preferred_element_type=jnp.float32), 0.0)
    recon = jnp.dot(hid.astype(jnp.bfloat16), w2_ref[...],
                    preferred_element_type=jnp.float32)                # (TN*W, F) f32

    # ---- MSE(reduction='none').mean(-1): lane-axis reduce, W stays on lanes -----------
    sq = (recon.reshape(TN, W, F) - x3) ** 2
    loss_w = jnp.sum(sq, axis=2) * (1.0 / F)                           # (TN, W)

    # ---- series_linear over the window axis (no bias) ---------------------------------
    col = jnp.sum(loss_w * ws_ref[...], axis=1, keepdims=True)         # (TN, 1)
    h_scr[i] = jnp.transpose(col)                                      # lane-dense (1, TN)

    # ---- tail: graph max-aggregation + graph_linear + softmax (last grid step only) ---
    @pl.when(i == pl.num_programs(0) - 1)
    def _():
        N = adj_ref.shape[0]
        NEG = jnp.float32(-1e30)
        h_row = h_scr[...].reshape(1, N)                               # (1, N) lane-dense
        h_col = jnp.transpose(h_row)                                   # (N, 1) tiny xpose
        edge = adj_ref[...] > 0                                        # self-loops removed
                                                                       # in the wrapper
        # pre[v] = max over predecessors u (edge u->v) of h[u]: sublane-axis masked max;
        # result is already a lane-dense row.
        pre_row = jnp.max(jnp.where(edge, jnp.broadcast_to(h_col, (N, N)), NEG),
                          axis=0, keepdims=True)                       # (1, N)
        # suc[u] = max over successors v (edge u->v) of h[v]: lane-axis masked max on the
        # SAME adjacency copy, then one small (N,1)->(1,N) transpose.
        suc_col = jnp.max(jnp.where(edge, jnp.broadcast_to(h_row, (N, N)), NEG),
                          axis=1, keepdims=True)                       # (N, 1)
        suc_row = jnp.transpose(suc_col)                               # (1, N)

        # DGL's max-reduce leaves 0 for nodes with no in-/out-edges.
        pre_row = jnp.where(pre_row > -1e29, pre_row, 0.0)
        suc_row = jnp.where(suc_row > -1e29, suc_row, 0.0)

        # graph_linear([pre, suc]) (bias-free) + softmax over nodes (lane axis).
        z = h_row + wg_ref[0] * pre_row + wg_ref[1] * suc_row          # (1, N)
        z = z - jnp.max(z, axis=1, keepdims=True)
        e = jnp.exp(z)
        out_ref[...] = e * pl.reciprocal(jnp.sum(e, axis=1, keepdims=True), approx=True)


# ----------------------------------------------------------------------------------
# Wrapper
# ----------------------------------------------------------------------------------
def fd_model_forward(feats, adj, params, *, block_nodes=None):
    """feats: (N, W, F) f32; adj: (N, N) f32 with adj[u, v] = 1 for edge u -> v."""
    N, W, F = feats.shape
    H = params["w1"].shape[1]
    if block_nodes is None:
        block_nodes = N                    # one grid step: N*W = 128 rows fills the MXU
    assert N % block_nodes == 0, "block_nodes must divide N"
    grid_n = N // block_nodes

    w1b = params["w1"].astype(jnp.bfloat16)        # bf16 MXU operands, half the weight DMA
    w2b = params["w2"].astype(jnp.bfloat16)
    ws = params["w_series"].reshape(1, W).astype(jnp.float32)
    # g.remove_self_loop(): mask is static per graph, precomputed once here.
    adj_ns = (adj * (1.0 - jnp.eye(N, dtype=adj.dtype))).astype(jnp.float32)

    scores_row = pl.pallas_call(
        fd_kernel,
        out_shape=jax.ShapeDtypeStruct((1, N), jnp.float32),
        grid=(grid_n,),
        in_specs=[
            pl.BlockSpec((block_nodes, W, F), lambda i: (i, 0, 0)),   # feats node-block
            pl.BlockSpec((F, H), lambda i: (0, 0)),                   # weights resident
            pl.BlockSpec((H, F), lambda i: (0, 0)),
            pl.BlockSpec((1, W), lambda i: (0, 0)),
            pl.BlockSpec((N, N), lambda i: (0, 0)),                   # adjacency resident
            pl.BlockSpec(memory_space=pltpu.MemorySpace.SMEM),        # graph_linear weight
        ],
        out_specs=pl.BlockSpec((1, N), lambda i: (0, 0)),             # lane-dense, resident
        scratch_shapes=[pltpu.VMEM((grid_n, 1, block_nodes), jnp.float32)],
        compiler_params=pltpu.CompilerParams(
            # output block is revisited across the grid and the scratch carries state,
            # so the (usually length-1) grid axis must be sequential.
            dimension_semantics=("arbitrary",)),
    )(feats, w1b, w2b, ws, adj_ns, params["w_graph"])

    return scores_row.reshape(N, 1)


# ----------------------------------------------------------------------------------
# Pure-JAX reference mirroring the torch forward.
# ----------------------------------------------------------------------------------
def fd_reference(feats, adj, params):
    N, W, F = feats.shape
    recon = jnp.maximum(
        jnp.einsum("nwf,fh->nwh", feats, params["w1"], precision="highest"), 0.0)
    recon = jnp.einsum("nwh,hf->nwf", recon, params["w2"], precision="highest")
    loss_series = jnp.mean((recon - feats) ** 2, axis=-1)                 # (N, W)
    series_h = loss_series @ params["w_series"].reshape(W, 1)             # (N, 1)
    a = adj * (1.0 - jnp.eye(N))
    h = series_h[:, 0]
    pre = jnp.where(a.max(0) > 0,
                    jnp.max(jnp.where(a > 0, h[:, None], -jnp.inf), axis=0), 0.0)
    suc = jnp.where(a.max(1) > 0,
                    jnp.max(jnp.where(a > 0, h[None, :], -jnp.inf), axis=1), 0.0)
    graph_h = params["w_graph"][0] * pre + params["w_graph"][1] * suc
    z = series_h[:, 0] + graph_h
    return jax.nn.softmax(z, axis=0)[:, None]


if __name__ == "__main__":
    N, W, F, H = 16, 8, 32, 16        # nodes, window_size, feature dim, GAE hidden
    key = jax.random.PRNGKey(0)
    k1, k2, k3, k4 = jax.random.split(key, 4)

    feats = jax.random.normal(k1, (N, W, F), dtype=jnp.float32)
    adj = (jax.random.uniform(k2, (N, N)) < 0.25).astype(jnp.float32)

    base_params = dict(
        # synthetic GAE (injected module in the torch code) -- deterministic init
        w1=0.1 * jax.random.normal(k3, (F, H), dtype=jnp.float32),
        w2=0.1 * jax.random.normal(k4, (H, F), dtype=jnp.float32),
        # series_linear init: weight = 1/window_size everywhere, no bias
        w_series=jnp.full((W,), 1.0 / W, dtype=jnp.float32),
        # graph_linear init in the torch code: [0, -0]
        w_graph=jnp.array([0.0, -0.0], dtype=jnp.float32),
    )
    # Also exercise the graph-aggregation path with non-zero graph_linear weights.
    trained_params = dict(base_params,
                          w_graph=jnp.array([0.35, -0.15], dtype=jnp.float32))

    for p in (base_params, trained_params):
        ref = fd_reference(feats, adj, p)
        # Default: single fused grid step (TR = N*W = 128).  Also exercise the
        # multi-block path (grid of 2) to validate the scratch-carry + pl.when tail.
        for bn in (None, 8):
            out = fd_model_forward(feats, adj, p, block_nodes=bn)
            jax.block_until_ready(out)
            assert out.shape == (N, 1)
            assert jnp.allclose(jnp.sum(out), 1.0, atol=5e-3)
            assert jnp.allclose(out, ref, atol=2e-3, rtol=1e-2), \
                float(jnp.max(jnp.abs(out - ref)))

    print("KERNEL_OK")
</pallas_src>

<mosaic_0001>
module attributes {stable_mosaic.version = 11 : i64} {
  func.func @fd_kernel(%arg0: i32, %arg1: memref<16x8x32xf32, #tpu.memory_space<vmem>>, %arg2: memref<32x16xbf16, #tpu.memory_space<vmem>>, %arg3: memref<16x32xbf16, #tpu.memory_space<vmem>>, %arg4: memref<1x8xf32, #tpu.memory_space<vmem>>, %arg5: memref<16x16xf32, #tpu.memory_space<vmem>>, %arg6: memref<2xf32, #tpu.memory_space<smem>>, %arg7: memref<1x16xf32, #tpu.memory_space<vmem>>, %arg8: memref<1x1x16xf32, #tpu.memory_space<vmem>>) attributes {dimension_semantics = [#tpu.dimension_semantics<arbitrary>], iteration_bounds = array<i64: 1>, scalar_prefetch = 0 : i64, scratch_operands = 1 : i64, tpu.core_type = #tpu.core_type<tc>, window_params = [{transform_indices = @transform_0, window_bounds = array<i64: 16, 8, 32>}, {pipeline_mode = #tpu.pipeline_mode<synchronous>, transform_indices = @transform_1, window_bounds = array<i64: 32, 16>}, {pipeline_mode = #tpu.pipeline_mode<synchronous>, transform_indices = @transform_2, window_bounds = array<i64: 16, 32>}, {pipeline_mode = #tpu.pipeline_mode<synchronous>, transform_indices = @transform_3, window_bounds = array<i64: 1, 8>}, {pipeline_mode = #tpu.pipeline_mode<synchronous>, transform_indices = @transform_4, window_bounds = array<i64: 16, 16>}, {transform_indices = @transform_5, window_bounds = array<i64: 2>}, {pipeline_mode = #tpu.pipeline_mode<synchronous>, transform_indices = @transform_6, window_bounds = array<i64: 1, 16>}]} {
    %c0 = arith.constant 0 : index
    %c0_0 = arith.constant 0 : index
    %c0_1 = arith.constant 0 : index
    %0 = vector.load %arg1[%c0, %c0_0, %c0_1] : memref<16x8x32xf32, #tpu.memory_space<vmem>>, vector<16x8x32xf32>
    %1 = vector.shape_cast %0 : vector<16x8x32xf32> to vector<128x32xf32>
    %2 = arith.truncf %1 : vector<128x32xf32> to vector<128x32xbf16>
    %c0_2 = arith.constant 0 : index
    %c0_3 = arith.constant 0 : index
    %3 = vector.load %arg2[%c0_2, %c0_3] : memref<32x16xbf16, #tpu.memory_space<vmem>>, vector<32x16xbf16>
    %cst = arith.constant dense<0.000000e+00> : vector<128x16xf32>
    %4 = tpu.matmul %2, %3, %cst {dimension_numbers = #tpu.dot_dimension_numbers<[1], [0], [0], [1], [0, 0, 1, 1], [], []>} : vector<128x32xbf16>, vector<32x16xbf16>, vector<128x16xf32> -> vector<128x16xf32>
    %cst_4 = arith.constant 0.000000e+00 : f32
    %5 = vector.broadcast %cst_4 : f32 to vector<128x16xf32>
    %6 = arith.maximumf %4, %5 : vector<128x16xf32>
    %7 = arith.truncf %6 : vector<128x16xf32> to vector<128x16xbf16>
    %c0_5 = arith.constant 0 : index
    %c0_6 = arith.constant 0 : index
    %8 = vector.load %arg3[%c0_5, %c0_6] : memref<16x32xbf16, #tpu.memory_space<vmem>>, vector<16x32xbf16>
    %cst_7 = arith.constant dense<0.000000e+00> : vector<128x32xf32>
    %9 = tpu.matmul %7, %8, %cst_7 {dimension_numbers = #tpu.dot_dimension_numbers<[1], [0], [0], [1], [0, 0, 1, 1], [], []>} : vector<128x16xbf16>, vector<16x32xbf16>, vector<128x32xf32> -> vector<128x32xf32>
    %10 = vector.shape_cast %9 : vector<128x32xf32> to vector<16x8x32xf32>
    %11 = arith.subf %10, %0 : vector<16x8x32xf32>
    %12 = arith.mulf %11, %11 : vector<16x8x32xf32>
    %cst_8 = arith.constant dense<0.000000e+00> : vector<16x8xf32>
    %13 = vector.multi_reduction <add>, %12, %cst_8 [2] : vector<16x8x32xf32> to vector<16x8xf32>
    %cst_9 = arith.constant 3.125000e-02 : f32
    %14 = vector.broadcast %cst_9 : f32 to vector<16x8xf32>
    %15 = arith.mulf %13, %14 : vector<16x8xf32>
    %c0_10 = arith.constant 0 : index
    %c0_11 = arith.constant 0 : index
    %16 = vector.load %arg4[%c0_10, %c0_11] : memref<1x8xf32, #tpu.memory_space<vmem>>, vector<1x8xf32>
    %17 = vector.broadcast %16 : vector<1x8xf32> to vector<16x8xf32>
    %18 = arith.mulf %15, %17 : vector<16x8xf32>
    %cst_12 = arith.constant dense<0.000000e+00> : vector<16xf32>
    %19 = vector.multi_reduction <add>, %18, %cst_12 [1] : vector<16x8xf32> to vector<16xf32>
    %20 = vector.shape_cast %19 : vector<16xf32> to vector<16x1xf32>
    %21 = tpu.transpose %20, [1, 0] : vector<16x1xf32> -> vector<1x16xf32>
    %22 = arith.index_cast %arg0 : i32 to index
    %c0_13 = arith.constant 0 : index
    %c0_14 = arith.constant 0 : index
    %23 = vector.load %arg8[%22, %c0_13, %c0_14] : memref<1x1x16xf32, #tpu.memory_space<vmem>>, vector<1x1x16xf32>
    %24 = vector.shape_cast %23 : vector<1x1x16xf32> to vector<1x16xf32>
    %25 = vector.shape_cast %21 : vector<1x16xf32> to vector<1x1x16xf32>
    tpu.vector_store %arg8[%22, %c0_13, %c0_14], %25 {strides = array<i32>} : memref<1x1x16xf32, #tpu.memory_space<vmem>>, vector<1x1x16xf32>,
    %c0_i32 = arith.constant 0 : i32
    %26 = arith.cmpi eq, %arg0, %c0_i32 : i32
    %27 = arith.extui %26 : i1 to i32
    %c0_i32_15 = arith.constant 0 : i32
    %28 = arith.cmpi ne, %27, %c0_i32_15 : i32
    scf.if %28 {
      %c0_16 = arith.constant 0 : index
      %c0_17 = arith.constant 0 : index
      %c0_18 = arith.constant 0 : index
      %29 = vector.load %arg8[%c0_16, %c0_17, %c0_18] : memref<1x1x16xf32, #tpu.memory_space<vmem>>, vector<1x1x16xf32>
      %30 = vector.shape_cast %29 : vector<1x1x16xf32> to vector<1x16xf32>
      %31 = tpu.transpose %30, [1, 0] : vector<1x16xf32> -> vector<16x1xf32>
      %c0_19 = arith.constant 0 : index
      %c0_20 = arith.constant 0 : index
      %32 = vector.load %arg5[%c0_19, %c0_20] : memref<16x16xf32, #tpu.memory_space<vmem>>, vector<16x16xf32>
      %cst_21 = arith.constant 0.000000e+00 : f32
      %33 = vector.broadcast %cst_21 : f32 to vector<16x16xf32>
      %34 = arith.cmpf ogt, %32, %33 : vector<16x16xf32>
      %35 = vector.shape_cast %31 : vector<16x1xf32> to vector<16x1xf32>
      %36 = vector.broadcast %35 : vector<16x1xf32> to vector<16x16xf32>
      %cst_22 = arith.constant -1.000000e+30 : f32
      %37 = vector.broadcast %cst_22 : f32 to vector<16x16xf32>
      %38 = arith.select %34, %36, %37 : vector<16x16xi1>, vector<16x16xf32>
      %cst_23 = arith.constant dense<0xFF800000> : vector<16xf32>
      %39 = vector.multi_reduction <maximumf>, %38, %cst_23 [0] : vector<16x16xf32> to vector<16xf32>
      %40 = vector.shape_cast %39 : vector<16xf32> to vector<1x16xf32>
      %41 = vector.shape_cast %30 : vector<1x16xf32> to vector<1x16xf32>
      %42 = vector.broadcast %41 : vector<1x16xf32> to vector<16x16xf32>
      %cst_24 = arith.constant -1.000000e+30 : f32
      %43 = vector.broadcast %cst_24 : f32 to vector<16x16xf32>
      %44 = arith.select %34, %42, %43 : vector<16x16xi1>, vector<16x16xf32>
      %cst_25 = arith.constant dense<0xFF800000> : vector<16xf32>
      %45 = vector.multi_reduction <maximumf>, %44, %cst_25 [1] : vector<16x16xf32> to vector<16xf32>
      %46 = vector.shape_cast %45 : vector<16xf32> to vector<16x1xf32>
      %47 = tpu.transpose %46, [1, 0] : vector<16x1xf32> -> vector<1x16xf32>
      %cst_26 = arith.constant -1.000000e+29 : f32
      %48 = vector.broadcast %cst_26 : f32 to vector<1x16xf32>
      %49 = arith.cmpf ogt, %40, %48 : vector<1x16xf32>
      %cst_27 = arith.constant 0.000000e+00 : f32
      %50 = vector.broadcast %cst_27 : f32 to vector<1x16xf32>
      %51 = arith.select %49, %40, %50 : vector<1x16xi1>, vector<1x16xf32>
      %cst_28 = arith.constant -1.000000e+29 : f32
      %52 = vector.broadcast %cst_28 : f32 to vector<1x16xf32>
      %53 = arith.cmpf ogt, %47, %52 : vector<1x16xf32>
      %cst_29 = arith.constant 0.000000e+00 : f32
      %54 = vector.broadcast %cst_29 : f32 to vector<1x16xf32>
      %55 = arith.select %53, %47, %54 : vector<1x16xi1>, vector<1x16xf32>
      %c0_30 = arith.constant 0 : index
      %56 = memref.load %arg6[%c0_30] : memref<2xf32, #tpu.memory_space<smem>>
      %57 = vector.broadcast %56 : f32 to vector<1x16xf32>
      %58 = arith.mulf %57, %51 : vector<1x16xf32>
      %59 = arith.addf %30, %58 : vector<1x16xf32>
      %c1 = arith.constant 1 : index
      %60 = memref.load %arg6[%c1] : memref<2xf32, #tpu.memory_space<smem>>
      %61 = vector.broadcast %60 : f32 to vector<1x16xf32>
      %62 = arith.mulf %61, %55 : vector<1x16xf32>
      %63 = arith.addf %59, %62 : vector<1x16xf32>
      %cst_31 = arith.constant dense<0xFF800000> : vector<1xf32>
      %64 = vector.multi_reduction <maximumf>, %63, %cst_31 [1] : vector<1x16xf32> to vector<1xf32>
      %65 = vector.shape_cast %64 : vector<1xf32> to vector<1x1xf32>
      %66 = vector.broadcast %65 : vector<1x1xf32> to vector<1x16xf32>
      %67 = arith.subf %63, %66 : vector<1x16xf32>
      %68 = math.exp %67 : vector<1x16xf32>
      %cst_32 = arith.constant dense<0.000000e+00> : vector<1xf32>
      %69 = vector.multi_reduction <add>, %68, %cst_32 [1] : vector<1x16xf32> to vector<1xf32>
      %70 = vector.shape_cast %69 : vector<1xf32> to vector<1x1xf32>
      %71 = tpu.reciprocal %70 {approx = true} : vector<1x1xf32> -> vector<1x1xf32>
      %72 = vector.broadcast %71 : vector<1x1xf32> to vector<1x16xf32>
      %73 = arith.mulf %68, %72 : vector<1x16xf32>
      %c0_33 = arith.constant 0 : index
      %c0_34 = arith.constant 0 : index
      %74 = vector.load %arg7[%c0_33, %c0_34] : memref<1x16xf32, #tpu.memory_space<vmem>>, vector<1x16xf32>
      tpu.vector_store %arg7[%c0_33, %c0_34], %73 {strides = array<i32>} : memref<1x16xf32, #tpu.memory_space<vmem>>, vector<1x16xf32>,
    } else {
    }
    return
  }
  func.func @transform_0(%arg0: i32) -> (i32, i32, i32) {
    %c0_i32 = arith.constant 0 : i32
    %c0_i32_0 = arith.constant 0 : i32
    %c0_i32_1 = arith.constant 0 : i32
    return %arg0, %c0_i32, %c0_i32_0 : i32, i32, i32
  }
  func.func @transform_1(%arg0: i32) -> (i32, i32) {
    %c0_i32 = arith.constant 0 : i32
    %c0_i32_0 = arith.constant 0 : i32
    %c0_i32_1 = arith.constant 0 : i32
    return %c0_i32, %c0_i32_0 : i32, i32
  }
  func.func @transform_2(%arg0: i32) -> (i32, i32) {
    %c0_i32 = arith.constant 0 : i32
    %c0_i32_0 = arith.constant 0 : i32
    %c0_i32_1 = arith.constant 0 : i32
    return %c0_i32, %c0_i32_0 : i32, i32
  }
  func.func @transform_3(%arg0: i32) -> (i32, i32) {
    %c0_i32 = arith.constant 0 : i32
    %c0_i32_0 = arith.constant 0 : i32
    %c0_i32_1 = arith.constant 0 : i32
    return %c0_i32, %c0_i32_0 : i32, i32
  }
  func.func @transform_4(%arg0: i32) -> (i32, i32) {
    %c0_i32 = arith.constant 0 : i32
    %c0_i32_0 = arith.constant 0 : i32
    %c0_i32_1 = arith.constant 0 : i32
    return %c0_i32, %c0_i32_0 : i32, i32
  }
  func.func @transform_5(%arg0: i32) -> i32 {
    %c0_i32 = arith.constant 0 : i32
    %c0_i32_0 = arith.constant 0 : i32
    return %c0_i32 : i32
  }
  func.func @transform_6(%arg0: i32) -> (i32, i32) {
    %c0_i32 = arith.constant 0 : i32
    %c0_i32_0 = arith.constant 0 : i32
    %c0_i32_1 = arith.constant 0 : i32
    return %c0_i32, %c0_i32_0 : i32, i32
  }
}

</mosaic_0001>

<bundles_post_ra>
// kernel: tpu_custom_call.1
= control target key start
LH: loop header
LB: loop body
LE: loop exit
PB: predicated region body
PF: predicated region fallthrough
CT: control target
= control target key end

     0   :  { %11 = vsyncpa [#allocation4], 0  ;;  %s1200_s0 = inlined_call_operand.hbm [shape: f32[16,8,32], index: 0, kind: input, shape index: {}]   ;;  %s1201_s1 = inlined_call_operand.vmem [shape: bf16[32,16], index: 1, kind: input, shape index: {}]   ;;  %s1202_s2 = inlined_call_operand.vmem [shape: bf16[16,32], index: 2, kind: input, shape index: {}]   ;;  %s1203_s3 = inlined_call_operand.vmem [shape: f32[1,8], index: 3, kind: input, shape index: {}]   ;;  %s1204_s4 = inlined_call_operand.vmem [shape: f32[16,16], index: 4, kind: input, shape index: {}]   ;;  %s1205_s5 = inlined_call_operand.vmem [shape: f32[2], index: 5, kind: input, shape index: {}]   ;;  %s1206_s6 = inlined_call_operand.hbm [shape: f32[1,16], index: 6, kind: output, shape index: {}]  }
   0x1   :  { %12 = vsyncpa [#allocation6], 0 }
   0x2   :  { %13 = vsyncpa [#allocation5], 0  ;;  %s988_s21 = smov [#allocation3]   ;;  %s40_s25 = sshll.u32 %s1205_s5, 4  ;;  %s41_s25 = int_to_ptr.vmem [resolvable:$true] %s40_s25 }
   0x3   :  { %s19_s22 = sshll.u32 %s988_s21, 4  ;;  %s926_s28 = scalar_lea.hbm %s1200_s0, 2048  ;;  %s20_s22 = int_to_ptr.vmem [resolvable:$true] %s19_s22 }
   0x4   :  { %p927_p0 = scmp.ne.s32.totalorder %s1200_s0, %s926_s28  ;;  %p930_p1 = scmp.lt.u32.totalorder %s926_s28, %s1200_s0 }
   0x6   :  { %p932_p2 = pnand %p930_p1, %p927_p0 }
   0x8   :  { %935 = shalt.err (!%p932_p2)
}
   0x9   :  { %s936_s9 = scalar_lea.vmem %s20_s22, 2048  ;;  %p941_p4 = scmp.lt.s32.totalorder %s20_s22, %s20_s22 }
   0xa   :  { %p937_p3 = scmp.ne.s32.totalorder %s20_s22, %s936_s9  ;;  %p942_p5 = scmp.lt.s32.totalorder %s936_s9, %s936_s9 }
   0xc   :  { %p943_p6 = por %p942_p5, %p941_p4 }
   0xe   :  { %p944_p7 = pnand %p943_p6, %p937_p3 }
  0x10   :  { %947 = shalt.err (!%p944_p7)
}
  0x11   :  { %s989_s5 = smov 128   ;;  %s990_s10 = smov 8  }
  0x12   :  { %25 = dma.hbm_to_vmem [thread:$0]  %s1200_s0, 2048, %s20_s22, [#allocation4], %s989_s5, %s989_s5, %s990_s10  }
  0x13   :  { %s948_s13 = scalar_lea.vmem %s41_s25, 16  ;;  %p953_p9 = scmp.lt.s32.totalorder %s41_s25, %s41_s25 }
  0x14   :  { %p949_p8 = scmp.ne.s32.totalorder %s41_s25, %s948_s13  ;;  %p954_p10 = scmp.lt.s32.totalorder %s948_s13, %s948_s13 }
  0x16   :  { %p955_p11 = por %p954_p10, %p953_p9 }
  0x18   :  { %p956_p12 = pnand %p955_p11, %p949_p8 }
  0x1a   :  { %959 = shalt.err (!%p956_p12)
}
  0x1b   :  { %s991_s14 = smov [#allocation7]  }
  0x1c   :  { %43 = dma.vmem_to_smem %s41_s25, 16, %s991_s14, [#allocation6]  }
  0x1d   :  { %982 = dma.done.wait [#allocation4], 2048  }
  0x1e   :  { %983 = vsyncadd [#allocation4], 4294965248 }
  0x1f   :  { %984 = dma.done.wait [#allocation6], 16  }
  0x20   :  { %985 = vsyncadd [#allocation6], 4294967280 }
  0x21   :  { %50 = sfence }
  0x22   :  { %v919_v0 = vld [vmem:[%s1201_s1] sm:$0xff]   ;;  %v920_v1 = vld [vmem:[%s1201_s1 + $0x8] sm:$0xff]   ;;  %vm92_vm0 = vcmask 261120   ;;  %v1056_v5 = vld [vmem:[#allocation3 + $0x10] sm:$0xff]  ;;  %vm246_vm1 = vcmask 130048   ;;  %vm620_vm2 = vcmask 1041409  }
  0x23   :  { %872 = vmatprep.subr.bf16.mxu0 %v919_v0  ;;  %v1050_v2 = vld [vmem:[#allocation3] sm:$0xff]  ;;  %v1052_v3 = vld [vmem:[#allocation3 + $0x8] sm:$0xff]  ;;  %v1058_v6 = vld [vmem:[#allocation3 + $0x18] sm:$0xff]  ;;  %vm622_vm3 = vcmask 1042434   ;;  %vm624_vm4 = vcmask 1043459   ;;  %vm626_vm5 = vcmask 1044484  }
  0x24   :  { %873 = vmatpush3.bf16.msra.mxu0 %v919_v0  ;;  %v68_v4 = vpack.c.bf16 %v1052_v3, %v1050_v2  ;;  %v1060_v7 = vld [vmem:[#allocation3 + $0x20] sm:$0xff]  ;;  %v1062_v8 = vld [vmem:[#allocation3 + $0x28] sm:$0xff]  ;;  %v69_v9 = vpack.c.bf16 %v1058_v6, %v1056_v5  ;;  %v1071_v11 = vld [vmem:[#allocation3 + $0x30] sm:$0xff]  ;;  %vm628_vm6 = vcmask 1045509   ;;  %vm630_vm7 = vcmask 1046534   ;;  %s852_s23 = sld [smem:[#allocation7 + $0x1]] }
  0x25   :  { %874 = vmatprep.subr.bf16.mxu0 %v920_v1  ;;  %v70_v10 = vpack.c.bf16 %v1062_v8, %v1060_v7  ;;  %v1073_v12 = vld [vmem:[#allocation3 + $0x38] sm:$0xff]  ;;  %v1075_v13 = vld [vmem:[#allocation3 + $0x40] sm:$0xff]  ;;  %v1077_v14 = vld [vmem:[#allocation3 + $0x48] sm:$0xff]  ;;  %vm632_vm8 = vcmask 1047559   ;;  %vm643_vm9 = vcmask 64512   ;;  %vm682_vm10 = vcmask 122880  }
  0x26   :  { %876 = vmatprep.mubr.msk.bf16.mxu0 %vm92_vm0, %v68_v4  ;;  %v71_v15 = vpack.c.bf16 %v1073_v12, %v1071_v11  ;;  %v72_v16 = vpack.c.bf16 %v1077_v14, %v1075_v13  ;;  %v1085_v17 = vld [vmem:[#allocation3 + $0x50] sm:$0xff]  ;;  %v1087_v18 = vld [vmem:[#allocation3 + $0x58] sm:$0xff]  ;;  %v1089_v19 = vld [vmem:[#allocation3 + $0x60] sm:$0xff]  ;;  %s993_s24 = smov [#allocation8]  }
  0x27   :  { %v1091_v20 = vld [vmem:[#allocation3 + $0x68] sm:$0xff]  ;;  %v73_v21 = vpack.c.bf16 %v1087_v18, %v1085_v17  ;;  %v1099_v23 = vld [vmem:[#allocation3 + $0x70] sm:$0xff]  ;;  %v1101_v24 = vld [vmem:[#allocation3 + $0x78] sm:$0xff]  ;;  %s822_s25 = sshll.u32 %s993_s24, 4  ;;  %s823_s25 = int_to_ptr.vmem [resolvable:$true] %s822_s25 }
  0x28   :  { %875 = vmatpush3.bf16.msra.mxu0 %v920_v1  ;;  %v74_v22 = vpack.c.bf16 %v1091_v20, %v1089_v19  ;;  %v75_v25 = vpack.c.bf16 %v1101_v24, %v1099_v23  ;;  %v921_v26 = vld [vmem:[%s1202_s2] sm:$0xff]   ;;  %s960_s26 = scalar_lea.vmem %s823_s25, 16  ;;  %s964_s27 = scalar_lea.vmem %s823_s25, 32 }
  0x29   :  { %892 = vmatprep.subr.bf16.mxu1 %v921_v26  ;;  %p961_p13 = scmp.ne.s32.totalorder %s823_s25, %s960_s26  ;;  %p965_p0 = scmp.lt.s32.totalorder %s823_s25, %s823_s25 }
  0x2a   :  { %893 = vmatpush3.bf16.msra.mxu1 %v921_v26  ;;  %p966_p1 = scmp.lt.s32.totalorder %s964_s27, %s960_s26 }
  0x2b   :  { %877 = vmatmul.mubr.msk.bf16.vlgmr.msra.gmra.mrb[0].mxu0 %vm92_vm0, %v69_v9 }
  0x2c   :  { %880 = vmatprep.mubr.msk.bf16.mxu0 %vm92_vm0, %v70_v10  ;;  %p967_p2 = por %p966_p1, %p965_p0 }
  0x2e   :  { %p968_p3 = pnand %p967_p2, %p961_p13 }
  0x33   :  { %881 = vmatmul.mubr.msk.bf16.gmra.mrb[4].mxu0 %vm92_vm0, %v71_v15 }
  0x34   :  { %884 = vmatprep.mubr.msk.bf16.mxu0 %vm92_vm0, %v72_v16 }
  0x3b   :  { %885 = vmatmul.mubr.msk.bf16.gmra.mrb[8].mxu0 %vm92_vm0, %v73_v21 }
  0x3c   :  { %888 = vmatprep.mubr.msk.bf16.mxu0 %vm92_vm0, %v74_v22 }
  0x43   :  { %889 = vmatmul.mubr.msk.bf16.gmra.mrb[12].mxu0 %vm92_vm0, %v75_v25 }
  0xfe   :  { %v878_v27 = vpop.f32.mrb[0].mxu0 }
  0xff   :  { %v151_v28 = vpop.f32.mrb[1].mxu0  ;;  %v216_v30 = vmax.f32 %v878_v27, 0.0 }
 0x100   :  { %v879_v29 = vpop.f32.mrb[2].mxu0  ;;  %v214_v33 = vmax.f32 %v151_v28, 0.0 }
 0x101   :  { %v217_v31 = vmax.f32 %v879_v29, 0.0  ;;  %v154_v32 = vpop.f32.mrb[3].mxu0 }
 0x102   :  { %v215_v34 = vmax.f32 %v154_v32, 0.0 }
 0x103   :  { %v231_v35 = vpack.c.bf16 %v217_v31, %v216_v30 }
 0x104   :  { %v230_v36 = vpack.c.bf16 %v215_v34, %v214_v33 }
 0x106   :  { %v882_v37 = vpop.f32.mrb[4].mxu0  ;;  %894 = vmatprep.mubr.msk.bf16.mxu1 %vm246_vm1, %v230_v36 }
 0x107   :  { %v220_v38 = vmax.f32 %v882_v37, 0.0  ;;  %v167_v39 = vpop.f32.mrb[5].mxu0  ;;  %895 = vmatmul.mubr.msk.bf16.vlgmr.msra.gmra.mrb[0].mxu1 %vm246_vm1, %v231_v35 }
 0x108   :  { %v883_v40 = vpop.f32.mrb[6].mxu0  ;;  %v218_v43 = vmax.f32 %v167_v39, 0.0 }
 0x109   :  { %v221_v41 = vmax.f32 %v883_v40, 0.0  ;;  %v170_v42 = vpop.f32.mrb[7].mxu0 }
 0x10a   :  { %v219_v44 = vmax.f32 %v170_v42, 0.0 }
 0x10b   :  { %v233_v45 = vpack.c.bf16 %v221_v41, %v220_v38 }
 0x10c   :  { %v232_v46 = vpack.c.bf16 %v219_v44, %v218_v43 }
 0x10e   :  { %v886_v47 = vpop.f32.mrb[8].mxu0  ;;  %898 = vmatprep.mubr.msk.bf16.mxu1 %vm246_vm1, %v232_v46 }
 0x10f   :  { %v224_v48 = vmax.f32 %v886_v47, 0.0  ;;  %v183_v49 = vpop.f32.mrb[9].mxu0  ;;  %899 = vmatmul.mubr.msk.bf16.gmra.mrb[4].mxu1 %vm246_vm1, %v233_v45 }
 0x110   :  { %v222_v50 = vmax.f32 %v183_v49, 0.0  ;;  %v887_v51 = vpop.f32.mrb[10].mxu0 }
 0x111   :  { %v225_v52 = vmax.f32 %v887_v51, 0.0  ;;  %v186_v53 = vpop.f32.mrb[11].mxu0 }
 0x112   :  { %v223_v54 = vmax.f32 %v186_v53, 0.0 }
 0x113   :  { %v235_v55 = vpack.c.bf16 %v225_v52, %v224_v48 }
 0x114   :  { %v234_v56 = vpack.c.bf16 %v223_v54, %v222_v50 }
 0x116   :  { %v890_v57 = vpop.f32.mrb[12].mxu0  ;;  %902 = vmatprep.mubr.msk.bf16.mxu1 %vm246_vm1, %v234_v56 }
 0x117   :  { %v228_v58 = vmax.f32 %v890_v57, 0.0  ;;  %v199_v59 = vpop.f32.mrb[13].mxu0  ;;  %903 = vmatmul.mubr.msk.bf16.gmra.mrb[8].mxu1 %vm246_vm1, %v235_v55 }
 0x118   :  { %v226_v60 = vmax.f32 %v199_v59, 0.0  ;;  %v891_v61 = vpop.f32.mrb[14].mxu0 }
 0x119   :  { %v229_v62 = vmax.f32 %v891_v61, 0.0  ;;  %v202_v63 = vpop.f32.mrb[15].mxu0 }
 0x11a   :  { %v227_v0 = vmax.f32 %v202_v63, 0.0 }
 0x11b   :  { %v237_v1 = vpack.c.bf16 %v229_v62, %v228_v58 }
 0x11c   :  { %v236_v4 = vpack.c.bf16 %v227_v0, %v226_v60 }
 0x11e   :  { %906 = vmatprep.mubr.msk.bf16.mxu1 %vm246_vm1, %v236_v4 }
 0x11f   :  { %907 = vmatmul.mubr.msk.bf16.gmra.mrb[12].mxu1 %vm246_vm1, %v237_v1 }
 0x1da   :  { %v896_v9 = vpop.f32.mrb[0].mxu1 }
 0x1db   :  { %v370_v10 = vsub.f32 %v896_v9, %v1056_v5  ;;  %v305_v15 = vpop.f32.mrb[1].mxu1 }
 0x1dc   :  { %v368_v16 = vsub.f32 %v305_v15, %v1050_v2  ;;  %v897_v21 = vpop.f32.mrb[2].mxu1 }
 0x1dd   :  { %v386_v22 = vmul.f32 %v370_v10, %v370_v10  ;;  %v371_v25 = vsub.f32 %v897_v21, %v1058_v6  ;;  %v308_v26 = vpop.f32.mrb[3].mxu1  ;;  %v992_v10 = vmov 0  }
 0x1de   :  { %v384_v27 = vmul.f32 %v368_v16, %v368_v16  ;;  %v369_v28 = vsub.f32 %v308_v26, %v1052_v3  ;;  %918 = vset.pattern.permute.xlu0 %v992_v10  ;;  %917 = vset.pattern.permute.xlu1 %v992_v10 }
 0x1df   :  { %v387_v29 = vmul.f32 %v371_v25, %v371_v25  ;;  %v406_v30 = vsel %vm92_vm0, %v386_v22, 0.0 }
 0x1e0   :  { %v385_v31 = vmul.f32 %v369_v28, %v369_v28  ;;  %407 = vadd.xlane.f32.xlu1 %v406_v30  ;;  %v400_v32 = vsel %vm92_vm0, %v384_v27, 0.0 }
 0x1e1   :  { %401 = vadd.xlane.f32.xlu0 %v400_v32  ;;  %v409_v34 = vsel %vm92_vm0, %v387_v29, 0.0 }
 0x1e2   :  { %v900_v5 = vpop.f32.mrb[4].mxu1  ;;  %v403_v3 = vsel %vm92_vm0, %v385_v31, 0.0 }
 0x1e3   :  { %v374_v33 = vsub.f32 %v900_v5, %v1071_v11  ;;  %v321_v2 = vpop.f32.mrb[5].mxu1 }
 0x1e4   :  { %v372_v6 = vsub.f32 %v321_v2, %v1060_v7  ;;  %410 = vadd.xlane.f32.xlu1 %v409_v34  ;;  %v901_v35 = vpop.f32.mrb[6].mxu1 }
 0x1e5   :  { %v390_v36 = vmul.f32 %v374_v33, %v374_v33  ;;  %404 = vadd.xlane.f32.xlu0 %v403_v3  ;;  %v324_v37 = vpop.f32.mrb[7].mxu1  ;;  %v375_v40 = vsub.f32 %v901_v35, %v1073_v12 }
 0x1e6   :  { %v388_v39 = vmul.f32 %v372_v6, %v372_v6  ;;  %v373_v7 = vsub.f32 %v324_v37, %v1062_v8 }
 0x1e7   :  { %v418_v38 = vsel %vm92_vm0, %v390_v36, 0.0  ;;  %v391_v43 = vmul.f32 %v375_v40, %v375_v40 }
 0x1e8   :  { %v412_v45 = vsel %vm92_vm0, %v388_v39, 0.0  ;;  %v389_v51 = vmul.f32 %v373_v7, %v373_v7 }
 0x1e9   :  { %419 = vadd.xlane.f32.xlu0 %v418_v38  ;;  %v421_v52 = vsel %vm92_vm0, %v391_v43, 0.0 }
 0x1ea   :  { %v904_v41 = vpop.f32.mrb[8].mxu1  ;;  %v415_v58 = vsel %vm92_vm0, %v389_v51, 0.0 }
 0x1eb   :  { %v378_v11 = vsub.f32 %v904_v41, %v1085_v17  ;;  %v337_v42 = vpop.f32.mrb[9].mxu1 }
 0x1ec   :  { %v905_v44 = vpop.f32.mrb[10].mxu1  ;;  %v376_v17 = vsub.f32 %v337_v42, %v1075_v13 }
 0x1ed   :  { %v394_v46 = vmul.f32 %v378_v11, %v378_v11  ;;  %v379_v47 = vsub.f32 %v905_v44, %v1087_v18  ;;  %413 = vadd.xlane.f32.xlu0 %v412_v45  ;;  %v340_v48 = vpop.f32.mrb[11].mxu1 }
 0x1ee   :  { %v377_v50 = vsub.f32 %v340_v48, %v1077_v14  ;;  %v392_v18 = vmul.f32 %v376_v17, %v376_v17 }
 0x1ef   :  { %v395_v49 = vmul.f32 %v379_v47, %v379_v47  ;;  %v430_v12 = vsel %vm92_vm0, %v394_v46, 0.0 }
 0x1f0   :  { %431 = vadd.xlane.f32.xlu1 %v430_v12  ;;  %v393_v53 = vmul.f32 %v377_v50, %v377_v50  ;;  %v424_v63 = vsel %vm92_vm0, %v392_v18, 0.0 }
 0x1f1   :  { %422 = vadd.xlane.f32.xlu0 %v421_v52  ;;  %v433_v55 = vsel %vm92_vm0, %v395_v49, 0.0 }
 0x1f2   :  { %v908_v8 = vpop.f32.mrb[12].mxu1  ;;  %v427_v61 = vsel %vm92_vm0, %v393_v53, 0.0 }
 0x1f3   :  { %v353_v54 = vpop.f32.mrb[13].mxu1  ;;  %v382_v56 = vsub.f32 %v908_v8, %v1099_v23 }
 0x1f4   :  { %v380_v57 = vsub.f32 %v353_v54, %v1089_v19  ;;  %434 = vadd.xlane.f32.xlu1 %v433_v55  ;;  %v909_v14 = vpop.f32.mrb[14].mxu1 }
 0x1f5   :  { %416 = vadd.xlane.f32.xlu0 %v415_v58  ;;  %v356_v13 = vpop.f32.mrb[15].mxu1  ;;  %v398_v62 = vmul.f32 %v382_v56, %v382_v56  ;;  %v383_v23 = vsub.f32 %v909_v14, %v1101_v24  ;;  %v851_v24 = vld [vmem:[%s1203_s3] ss:$0 sm:$0xff] }
 0x1f6   :  { %v396_v59 = vmul.f32 %v380_v57, %v380_v57  ;;  %v381_v60 = vsub.f32 %v356_v13, %v1091_v20  ;;  %v554_v13 = vlaneseq }
 0x1f7   :  { %v442_v1 = vsel %vm92_vm0, %v398_v62, 0.0  ;;  %v399_v4 = vmul.f32 %v383_v23, %v383_v23 }
 0x1f8   :  { %428 = vadd.xlane.f32.xlu1 %v427_v61  ;;  %v397_v0 = vmul.f32 %v381_v60, %v381_v60  ;;  %v436_v19 = vsel %vm92_vm0, %v396_v59, 0.0  ;;  %v555_v61 = vand.u32 127, %v554_v13  ;;  %v1152_v62 = vshrl.u32 %v554_v13, 7 }
 0x1f9   :  { %425 = vadd.xlane.f32.xlu0 %v424_v63  ;;  %v445_v20 = vsel %vm92_vm0, %v399_v4, 0.0 }
 0x1fa   :  { %v439_v9 = vsel %vm92_vm0, %v397_v0, 0.0  ;;  %v558_v0 = vsub.s32 %v555_v61, %v1152_v62 }
 0x1fc   :  { %437 = vadd.xlane.f32.xlu1 %v436_v19 }
 0x1fd   :  { %443 = vadd.xlane.f32.xlu0 %v442_v1 }
 0x200   :  { %440 = vadd.xlane.f32.xlu1 %v439_v9 }
 0x204   :  { %446 = vadd.xlane.f32.xlu1 %v445_v20 }
 0x213   :  { %471 = vbcast.lane.b32.xlu0 %v851_v24, 256 }
 0x26d   :  { %v408_v27 = vpop.xlane.xlu1 %407 }
 0x26e   :  { %v402_v15 = vpop.xlane.xlu0 %401  ;;  %v450_v31 = vmul.f32 0.03125, %v408_v27 }
 0x26f   :  { %v448_v6 = vmul.f32 0.03125, %v402_v15 }
 0x271   :  { %v411_v29 = vpop.xlane.xlu1 %410 }
 0x272   :  { %v405_v16 = vpop.xlane.xlu0 %404  ;;  %v451_v32 = vmul.f32 0.03125, %v411_v29 }
 0x273   :  { %v449_v38 = vmul.f32 0.03125, %v405_v16 }
 0x276   :  { %v420_v21 = vpop.xlane.xlu0 %419 }
 0x277   :  { %v454_v35 = vmul.f32 0.03125, %v420_v21 }
 0x27a   :  { %v414_v22 = vpop.xlane.xlu0 %413 }
 0x27b   :  { %v452_v39 = vmul.f32 0.03125, %v414_v22 }
 0x27d   :  { %v432_v5 = vpop.xlane.xlu1 %431 }
 0x27e   :  { %v423_v25 = vpop.xlane.xlu0 %422  ;;  %v458_v11 = vmul.f32 0.03125, %v432_v5 }
 0x27f   :  { %v455_v42 = vmul.f32 0.03125, %v423_v25 }
 0x281   :  { %v435_v37 = vpop.xlane.xlu1 %434 }
 0x282   :  { %v417_v26 = vpop.xlane.xlu0 %416  ;;  %v459_v50 = vmul.f32 0.03125, %v435_v37 }
 0x283   :  { %v453_v45 = vmul.f32 0.03125, %v417_v26 }
 0x285   :  { %v429_v43 = vpop.xlane.xlu1 %428 }
 0x286   :  { %v426_v28 = vpop.xlane.xlu0 %425  ;;  %v457_v52 = vmul.f32 0.03125, %v429_v43 }
 0x287   :  { %v456_v46 = vmul.f32 0.03125, %v426_v28 }
 0x289   :  { %v438_v49 = vpop.xlane.xlu1 %437 }
 0x28a   :  { %v444_v30 = vpop.xlane.xlu0 %443  ;;  %v460_v54 = vmul.f32 0.03125, %v438_v49 }
 0x28b   :  { %v462_v12 = vmul.f32 0.03125, %v444_v30 }
 0x28d   :  { %v441_v8 = vpop.xlane.xlu1 %440 }
 0x28e   :  { %v472_v33 = vpop.permute.xlu0 %471  ;;  %v461_v55 = vmul.f32 0.03125, %v441_v8  ;;  %v721_v8 = vld [vmem:[%s1204_s4] sm:$0xff] }
 0x28f   :  { %v477_v2 = vmul.f32 %v472_v33, %v451_v32  ;;  %v476_v34 = vmul.f32 %v472_v33, %v450_v31  ;;  %v480_v3 = vmul.f32 %v472_v33, %v454_v35  ;;  %v474_v36 = vmul.f32 %v472_v33, %v448_v6 }
 0x290   :  { %v478_v40 = vmul.f32 %v472_v33, %v452_v39  ;;  %v475_v41 = vmul.f32 %v472_v33, %v449_v38  ;;  %v481_v7 = vmul.f32 %v472_v33, %v455_v42  ;;  %v484_v44 = vmul.f32 %v472_v33, %v458_v11 }
 0x291   :  { %516 = vperm.xlu0 %918, %v477_v2   ;;  %513 = vperm.xlu1 %917, %v476_v34   ;;  %v479_v47 = vmul.f32 %v472_v33, %v453_v45  ;;  %v482_v48 = vmul.f32 %v472_v33, %v456_v46  ;;  %v488_v51 = vmul.f32 %v472_v33, %v462_v12  ;;  %v447_v56 = vpop.xlane.xlu1 %446  ;;  %vm723_vm11 = vcmp.gt.f32.partialorder %v721_v8, 0.0 }
 0x292   :  { %v485_v17 = vmul.f32 %v472_v33, %v459_v50  ;;  %v483_v53 = vmul.f32 %v472_v33, %v457_v52  ;;  %v486_v18 = vmul.f32 %v472_v33, %v460_v54  ;;  %v463_v57 = vmul.f32 0.03125, %v447_v56 }
 0x293   :  { %v487_v14 = vmul.f32 %v472_v33, %v461_v55 }
 0x294   :  { %v489_v58 = vmul.f32 %v472_v33, %v463_v57  ;;  %v722_v57 = vld [vmem:[%s1204_s4 + $0x8] sm:$0xff]  ;;  %s796_s4 = sld [smem:[#allocation7]] }
 0x295   :  { %525 = vperm.xlu0 %918, %v480_v3   ;;  %507 = vperm.xlu1 %917, %v474_v36   ;;  %vm724_vm12 = vcmp.gt.f32.partialorder %v722_v57, 0.0 }
 0x299   :  { %519 = vperm.xlu0 %918, %v478_v40   ;;  %510 = vperm.xlu1 %917, %v475_v41  }
 0x29d   :  { %528 = vperm.xlu0 %918, %v481_v7   ;;  %537 = vperm.xlu1 %917, %v484_v44  }
 0x2a1   :  { %522 = vperm.xlu0 %918, %v479_v47   ;;  %531 = vperm.xlu1 %917, %v482_v48  }
 0x2a5   :  { %549 = vperm.xlu0 %918, %v488_v51   ;;  %540 = vperm.xlu1 %917, %v485_v17  }
 0x2a9   :  { %534 = vperm.xlu1 %917, %v483_v53   ;;  %v749_v53 = vsub.s32 0, %v1152_v62 }
 0x2ad   :  { %543 = vperm.xlu1 %917, %v486_v18  }
 0x2b1   :  { %546 = vperm.xlu1 %917, %v487_v14  }
 0x2b5   :  { %552 = vperm.xlu1 %917, %v489_v58  }
 0x310   :  { %v517_v59 = vpop.permute.xlu0 %516  ;;  %v514_v60 = vpop.permute.xlu1 %513 }
 0x311   :  { %v567_v20 = vrot.slane %v514_v60, %v558_v0  ;;  %v571_v21 = vrot.slane %v517_v59, %v558_v0 }
 0x314   :  { %v526_v63 = vpop.permute.xlu0 %525  ;;  %v508_v23 = vpop.permute.xlu1 %507 }
 0x315   :  { %v559_v4 = vrot.slane %v508_v23, %v558_v0  ;;  %v583_v29 = vrot.slane %v526_v63, %v558_v0 }
 0x318   :  { %v520_v19 = vpop.permute.xlu0 %519  ;;  %v511_v1 = vpop.permute.xlu1 %510 }
 0x319   :  { %v563_v9 = vrot.slane %v511_v1, %v558_v0  ;;  %v575_v25 = vrot.slane %v520_v19, %v558_v0 }
 0x31b   :  { %v621_v10 = vsel %vm620_vm2, %v563_v9, %v559_v4 }
 0x31c   :  { %v623_v24 = vsel %vm622_vm3, %v567_v20, %v621_v10  ;;  %v529_v15 = vpop.permute.xlu0 %528  ;;  %v538_v16 = vpop.permute.xlu1 %537 }
 0x31d   :  { %v625_v22 = vsel %vm624_vm4, %v571_v21, %v623_v24  ;;  %v587_v31 = vrot.slane %v529_v15, %v558_v0  ;;  %v599_v36 = vrot.slane %v538_v16, %v558_v0 }
 0x31e   :  { %v627_v30 = vsel %vm626_vm5, %v575_v25, %v625_v22  ;;  %v797_v22 = vstv %s796_s4 }
 0x320   :  { %v523_v26 = vpop.permute.xlu0 %522  ;;  %v532_v27 = vpop.permute.xlu1 %531 }
 0x321   :  { %v579_v28 = vrot.slane %v523_v26, %v558_v0  ;;  %v591_v35 = vrot.slane %v532_v27, %v558_v0  ;;  %v801_v26 = vstv %s852_s23 }
 0x323   :  { %v629_v32 = vsel %vm628_vm6, %v579_v28, %v627_v30 }
 0x324   :  { %v541_v5 = vpop.permute.xlu1 %540  ;;  %v631_v33 = vsel %vm630_vm7, %v583_v29, %v629_v32  ;;  %v550_v43 = vpop.permute.xlu0 %549 }
 0x325   :  { %v633_v2 = vsel %vm632_vm8, %v587_v31, %v631_v33  ;;  %v603_v40 = vrot.slane %v541_v5, %v558_v0  ;;  %v615_v46 = vrot.slane %v550_v43, %v558_v0 }
 0x326   :  { %v644_v34 = vsel %vm643_vm9, %v633_v2, 0.0 }
 0x327   :  { %645 = vadd.xlane.f32.xlu0 %v644_v34 }
 0x328   :  { %v535_v6 = vpop.permute.xlu1 %534 }
 0x329   :  { %v595_v3 = vrot.slane %v535_v6, %v558_v0 }
 0x32b   :  { %v634_v37 = vsel %vm620_vm2, %v595_v3, %v591_v35 }
 0x32c   :  { %v635_v38 = vsel %vm622_vm3, %v599_v36, %v634_v37  ;;  %v544_v39 = vpop.permute.xlu1 %543 }
 0x32d   :  { %v607_v41 = vrot.slane %v544_v39, %v558_v0  ;;  %v636_v11 = vsel %vm624_vm4, %v603_v40, %v635_v38 }
 0x32f   :  { %v637_v44 = vsel %vm626_vm5, %v607_v41, %v636_v11 }
 0x330   :  { %v547_v42 = vpop.permute.xlu1 %546 }
 0x331   :  { %v611_v7 = vrot.slane %v547_v42, %v558_v0 }
 0x333   :  { %v638_v45 = vsel %vm628_vm6, %v611_v7, %v637_v44 }
 0x334   :  { %v553_v47 = vpop.permute.xlu1 %552  ;;  %v639_v49 = vsel %vm630_vm7, %v615_v46, %v638_v45 }
 0x335   :  { %v619_v48 = vrot.slane %v553_v47, %v558_v0 }
 0x337   :  { %v640_v50 = vsel %vm632_vm8, %v619_v48, %v639_v49 }
 0x338   :  { %v647_v12 = vsel %vm643_vm9, %v640_v50, 0.0 }
 0x339   :  { %648 = vadd.xlane.f32.xlu1 %v647_v12 }
 0x3b4   :  { %v646_v51 = vpop.xlane.xlu0 %645 }
 0x3b5   :  { %650 = vxpose.xlu0.b32.start [1/2] (short) (narrow) %v646_v51, 8 }
 0x3c6   :  { %v649_v17 = vpop.xlane.xlu1 %648 }
 0x3c7   :  { %651 = vxpose.xlu0.b32.end [2/2] (short) (narrow) %v649_v17, 8 }
 0x443   :  { %v666_v52 = vpop.trf.xlu0 }
 0x444   :  { %683 = vst.msk [vmem:[#allocation2] sm:$0x1] %vm682_vm10, %v666_v52 }
 0x44b   :  { %v688_v54 = vld [vmem:[#allocation2] sm:$0x1] }
 0x44c   :  { %689 = vxpose.xlu1.b32.start.end [1/1] (short) (narrow) %v688_v54, 16  ;;  %v750_v55 = vrot.slane %v688_v54, %v749_v53 }
 0x44e   :  { %v752_v18 = vsel %vm723_vm11, %v750_v55, -1e+30  ;;  %v753_v14 = vsel %vm724_vm12, %v750_v55, -1e+30 }
 0x44f   :  { %v754_v56 = vsel %vm246_vm1, %v752_v18, -inf  ;;  %v757_v58 = vsel %vm246_vm1, %v753_v14, -inf }
 0x450   :  { %755 = vmax.xlane.f32.xlu0 %v754_v56 }
 0x477   :  { %758 = vmax.xlane.f32.xlu1 %v757_v58 }
 0x4cc   :  { %v705_v13 = vpop.trf.xlu1 }
 0x4cd   :  { %727 = vperm.xlu0 %918, %v705_v13  }
 0x4d0   :  { %v706_v59 = vpop.trf.xlu1 }
 0x4d1   :  { %732 = vperm.xlu1 %917, %v706_v59  }
 0x4dd   :  { %v756_v60 = vpop.xlane.xlu0 %755 }
 0x4eb   :  { %760 = vxpose.xlu0.b32.start [1/2] (short) (narrow) %v756_v60, 8 }
 0x504   :  { %v759_v61 = vpop.xlane.xlu1 %758 }
 0x505   :  { %761 = vxpose.xlu0.b32.end [2/2] (short) (narrow) %v759_v61, 8 }
 0x54c   :  { %v728_v63 = vpop.permute.xlu0 %727 }
 0x54d   :  { %v735_v0 = vsel %vm723_vm11, %v728_v63, -1e+30 }
 0x54e   :  { %v737_v1 = vsel %vm246_vm1, %v735_v0, -inf }
 0x550   :  { %v733_v62 = vpop.permute.xlu1 %732 }
 0x551   :  { %v736_v23 = vsel %vm724_vm12, %v733_v62, -1e+30 }
 0x552   :  { %v738_v19 = vsel %vm246_vm1, %v736_v23, -inf }
 0x553   :  { %v739_v4 = vmax.f32 %v737_v1, %v738_v19 }
 0x555   :  { %v740_v9 = vrot.slane %v739_v4, 4 }
 0x557   :  { %v741_v20 = vmax.f32 %v739_v4, %v740_v9 }
 0x559   :  { %v742_v10 = vrot.slane %v741_v20, 2 }
 0x55b   :  { %v743_v24 = vmax.f32 %v741_v20, %v742_v10 }
 0x55d   :  { %v744_v15 = vrot.slane %v743_v24, 1 }
 0x55f   :  { %v745_v16 = vmax.f32 %v743_v24, %v744_v15 }
 0x561   :  { %vm792_vm13 = vcmp.gt.f32.partialorder %v745_v16, -1e+29 }
 0x562   :  { %v793_v21 = vsel %vm792_vm13, %v745_v16, 0.0 }
 0x563   :  { %v798_v25 = vmul.f32 %v797_v22, %v793_v21 }
 0x565   :  { %v799_v30 = vadd.f32 %v798_v25, %v688_v54 }
 0x581   :  { %v776_v27 = vpop.trf.xlu0 }
 0x582   :  { %vm794_vm14 = vcmp.gt.f32.partialorder %v776_v27, -1e+29 }
 0x583   :  { %v795_v28 = vsel %vm794_vm14, %v776_v27, 0.0 }
 0x584   :  { %v802_v29 = vmul.f32 %v801_v26, %v795_v28 }
 0x586   :  { %v803_v31 = vadd.f32 %v802_v29, %v799_v30 }
 0x588   :  { %v804_v32 = vsel %vm682_vm10, %v803_v31, -inf }
 0x589   :  { %805 = vmax.xlane.f32.xlu1 %v804_v32 }
 0x616   :  { %v806_v5 = vpop.xlane.xlu1 %805 }
 0x617   :  { %v807_v33 = vsub.f32 %v803_v31, %v806_v5 }
 0x619   :  { %v808_v2 = vmul.f32 1.442695, %v807_v33 }
 0x61b   :  { %922 = vpow2.f32 %v808_v2 }
 0x625   :  { %v923_v34 = vpop.eup %922 }
 0x626   :  { %v810_v6 = vsel %vm682_vm10, %v923_v34, 0.0 }
 0x627   :  { %811 = vadd.xlane.f32.xlu0 %v810_v6 }
 0x6b4   :  { %v812_v35 = vpop.xlane.xlu0 %811 }
 0x6b5   :  { %924 = vrcp.f32 %v812_v35 }
 0x6bf   :  { %v925_v3 = vpop.eup %924 }
 0x6c0   :  { %v814_v36 = vmul.f32 %v925_v3, %v923_v34 }
 0x6c2   :  { %815 = vst.msk [vmem:[#allocation8] sm:$0x1] %vm682_vm10, %v814_v36 }
 0x6c3   :  { %971 = shalt.err (!%p968_p3)
}
 0x6c4   :  { %s972_s30 = scalar_lea.hbm %s1206_s6, 16 }
 0x6c5   :  { %p973_p4 = scmp.ne.s32.totalorder %s1206_s6, %s972_s30  ;;  %p976_p5 = scmp.lt.u32.totalorder %s972_s30, %s1206_s6 }
 0x6c7   :  { %p978_p6 = pnand %p976_p5, %p973_p4 }
 0x6c9   :  { %981 = shalt.err (!%p978_p6)
}
 0x6ca   :  { %825 = dma.vmem_to_hbm [thread:$0]  %s823_s25, 16, %s1206_s6, [#allocation5]  }
 0x6cb   :  { %986 = dma.done.wait [#allocation5], 16  }
 0x6cc   :  { %987 = vsyncadd [#allocation5], 4294967280 }
 0x6cd   :  { %829 = vsyncpa [#allocation4], 1 }
 0x6ce   :  { %830 = vsyncpa [#allocation5], 1 }
 0x6cf   :  { %831 = vsyncpa [#allocation6], 1 }

</bundles_post_ra>
